<compile_context>
chip_gen: v5e
topology: v5e:2x2
jax: 0.10.0
libtpu: 0.0.40
codegen_flags: <defaults>
</compile_context>

<pallas_src>
import functools

import jax
import jax.numpy as jnp
from jax.experimental import pallas as pl
from jax.experimental.pallas import tpu as pltpu


def _round_up(n, m):
    return ((n + m - 1) // m) * m


def _samo_kernel(x_ref, w_ref, lab_ref, sp_ref, final_ref,
                 *, m_real, m_fake, alpha):
    # x tile: (TB, F); centers (already L2-normalized): (C, F); labels: (1, TB)
    xf = x_ref[...].astype(jnp.float32)
    w_n = w_ref[...].astype(jnp.float32)
    labels = lab_ref[...]

    # L2-normalize the rows of x with a fused reciprocal-sqrt (EUP).
    # rsqrt(max(||x||^2, eps^2)) == 1 / max(||x||, eps)  (torch F.normalize eps).
    eps2 = jnp.float32(1e-24)
    sumsq = jnp.sum(xf * xf, axis=1, keepdims=True)          # (TB, 1)
    inv = jax.lax.rsqrt(jnp.maximum(sumsq, eps2))             # (TB, 1)
    x_n = xf * inv                                            # (TB, F)

    # scores^T = w_n @ x_n^T  -> (C, TB).  Batch lands on the lane axis so the
    # whole elementwise tail and both outputs are lane-dense.
    scores_t = jax.lax.dot_general(
        w_n, x_n,
        dimension_numbers=(((1,), (1,)), ((), ())),
        preferred_element_type=jnp.float32,
    )                                                         # (C, TB)

    # Row max over the centers (sublane reduce) -> (1, TB).
    maxscores = jnp.max(scores_t, axis=0, keepdims=True)      # (1, TB)

    is_real = labels == 0
    is_fake = labels == 1
    adj = jnp.where(is_real, jnp.float32(m_real) - maxscores, maxscores)
    adj = jnp.where(is_fake, adj - jnp.float32(m_fake), adj)

    # Numerically stable softplus(alpha * adj).
    z = jnp.float32(alpha) * adj
    sp = jnp.maximum(z, 0.0) + jnp.log1p(jnp.exp(-jnp.abs(z)))

    sp_ref[...] = sp            # per-row softplus (mean finished in wrapper)
    final_ref[...] = maxscores  # final_scores (pre-margin row max)


def samo_forward(x, labels, center, *, m_real=0.5, m_fake=0.2, alpha=20.0,
                 block_b=4096):
    """Returns (loss, final_scores) matching SAMO.forward with attractor=0."""
    B, F = x.shape
    C, Fw = center.shape
    assert F == Fw

    # Hoisted center normalization (tiny C x F array, done once).
    c32 = center.astype(jnp.float32)
    eps = jnp.float32(1e-12)
    w_n = c32 / jnp.maximum(
        jnp.sqrt(jnp.sum(c32 * c32, axis=1, keepdims=True)), eps)

    # Batch tiling: TB must be a multiple of 8 (f32 sublanes); when there are
    # multiple tiles the lane-dense (1, TB) blocks additionally need TB % 128 == 0.
    if B <= block_b:
        TB = max(8, _round_up(B, 8))
    else:
        TB = _round_up(block_b, 128)
    B_pad = _round_up(B, TB)
    num_tiles = B_pad // TB

    labels_i32 = labels.astype(jnp.int32).reshape(-1)
    if B_pad != B:
        x_in = jnp.pad(x, ((0, B_pad - B), (0, 0)))
        # Pad with a label that is neither 0 nor 1; padded rows are sliced off.
        labels_i32 = jnp.pad(labels_i32, (0, B_pad - B), constant_values=2)
    else:
        x_in = x
    labels_row = labels_i32.reshape(1, B_pad)

    kernel = functools.partial(
        _samo_kernel, m_real=m_real, m_fake=m_fake, alpha=alpha)

    sp, final = pl.pallas_call(
        kernel,
        grid=(num_tiles,),
        in_specs=[
            pl.BlockSpec((TB, F), lambda i: (i, 0)),   # x tile
            pl.BlockSpec((C, F), lambda i: (0, 0)),    # centers, resident
            pl.BlockSpec((1, TB), lambda i: (0, i)),   # labels, lane-dense
        ],
        out_specs=(
            pl.BlockSpec((1, TB), lambda i: (0, i)),   # per-row softplus
            pl.BlockSpec((1, TB), lambda i: (0, i)),   # final scores
        ),
        out_shape=(
            jax.ShapeDtypeStruct((1, B_pad), jnp.float32),
            jax.ShapeDtypeStruct((1, B_pad), jnp.float32),
        ),
        compiler_params=pltpu.CompilerParams(
            dimension_semantics=("parallel",)),
    )(x_in, w_n, labels_row)

    # Finish the mean over the (unpadded) batch in the wrapper.
    loss = jnp.mean(sp[0, :B])
    final_scores = final[0, :B]
    return loss, final_scores


def samo_reference(x, labels, center, *, m_real=0.5, m_fake=0.2, alpha=20.0):
    """Pure-JAX reference mirroring the PyTorch code (attractor=0 path)."""
    eps = 1e-12
    x = x.astype(jnp.float32)
    center = center.astype(jnp.float32)
    x_n = x / jnp.maximum(jnp.linalg.norm(x, axis=1, keepdims=True), eps)
    w_n = center / jnp.maximum(
        jnp.linalg.norm(center, axis=1, keepdims=True), eps)
    scores = x_n @ w_n.T
    maxscores = jnp.max(scores, axis=1, keepdims=True)
    final_scores = maxscores
    lab = labels.reshape(-1, 1)
    adj = jnp.where(lab == 0, m_real - maxscores, maxscores)
    adj = jnp.where(lab == 1, adj - m_fake, adj)
    emb_loss = jnp.mean(jax.nn.softplus(alpha * adj))
    return emb_loss, final_scores[:, 0]


if __name__ == "__main__":
    # Module hyperparameters (shapes as implied by __init__ / forward).
    feat_dim = 32
    num_centers = 20
    m_real, m_fake, alpha = 0.5, 0.2, 20.0

    # 'one_hot' center initialization: torch.eye(feat_dim)[:num_centers]
    center = jnp.eye(feat_dim, dtype=jnp.float32)[:num_centers]

    key = jax.random.PRNGKey(0)

    # Small single-tile case.
    batch = 8
    kx, kl, key = jax.random.split(key, 3)
    x = jax.random.normal(kx, (batch, feat_dim), dtype=jnp.float32)
    labels = jax.random.bernoulli(kl, 0.5, (batch,)).astype(jnp.int32)

    loss, final_scores = samo_forward(
        x, labels, center, m_real=m_real, m_fake=m_fake, alpha=alpha)
    loss = jax.block_until_ready(loss)
    final_scores = jax.block_until_ready(final_scores)

    ref_loss, ref_final = samo_reference(
        x, labels, center, m_real=m_real, m_fake=m_fake, alpha=alpha)
    assert jnp.allclose(loss, ref_loss, atol=1e-5, rtol=1e-5), (loss, ref_loss)
    assert jnp.allclose(final_scores, ref_final, atol=1e-5, rtol=1e-5)

    # Multi-tile case (exercises the tiled/padded path: 300 -> 3 tiles of 128).
    batch2 = 300
    kx2, kl2, key = jax.random.split(key, 3)
    x2 = jax.random.normal(kx2, (batch2, feat_dim), dtype=jnp.float32)
    labels2 = jax.random.bernoulli(kl2, 0.5, (batch2,)).astype(jnp.int32)

    loss2, final2 = samo_forward(
        x2, labels2, center, m_real=m_real, m_fake=m_fake, alpha=alpha,
        block_b=128)
    loss2 = jax.block_until_ready(loss2)
    final2 = jax.block_until_ready(final2)

    ref_loss2, ref_final2 = samo_reference(
        x2, labels2, center, m_real=m_real, m_fake=m_fake, alpha=alpha)
    assert jnp.allclose(loss2, ref_loss2, atol=1e-5, rtol=1e-5), (loss2, ref_loss2)
    assert jnp.allclose(final2, ref_final2, atol=1e-5, rtol=1e-5)

    print("KERNEL_OK")
</pallas_src>

<mosaic_0001>
module attributes {stable_mosaic.version = 11 : i64} {
  func.func @_samo_kernel(%arg0: i32, %arg1: memref<8x32xf32, #tpu.memory_space<vmem>>, %arg2: memref<20x32xf32, #tpu.memory_space<vmem>>, %arg3: memref<1x8xi32, #tpu.memory_space<vmem>>, %arg4: memref<1x8xf32, #tpu.memory_space<vmem>>, %arg5: memref<1x8xf32, #tpu.memory_space<vmem>>) attributes {dimension_semantics = [#tpu.dimension_semantics<parallel>], iteration_bounds = array<i64: 1>, scalar_prefetch = 0 : i64, scratch_operands = 0 : i64, tpu.core_type = #tpu.core_type<tc>, window_params = [{transform_indices = @transform_0, window_bounds = array<i64: 8, 32>}, {pipeline_mode = #tpu.pipeline_mode<synchronous>, transform_indices = @transform_1, window_bounds = array<i64: 20, 32>}, {transform_indices = @transform_2, window_bounds = array<i64: 1, 8>}, {transform_indices = @transform_3, window_bounds = array<i64: 1, 8>}, {transform_indices = @transform_4, window_bounds = array<i64: 1, 8>}]} {
    %c0 = arith.constant 0 : index
    %c0_0 = arith.constant 0 : index
    %0 = vector.load %arg1[%c0, %c0_0] : memref<8x32xf32, #tpu.memory_space<vmem>>, vector<8x32xf32>
    %c0_1 = arith.constant 0 : index
    %c0_2 = arith.constant 0 : index
    %1 = vector.load %arg2[%c0_1, %c0_2] : memref<20x32xf32, #tpu.memory_space<vmem>>, vector<20x32xf32>
    %c0_3 = arith.constant 0 : index
    %c0_4 = arith.constant 0 : index
    %2 = vector.load %arg3[%c0_3, %c0_4] : memref<1x8xi32, #tpu.memory_space<vmem>>, vector<1x8xi32>
    %3 = arith.mulf %0, %0 : vector<8x32xf32>
    %cst = arith.constant dense<0.000000e+00> : vector<8xf32>
    %4 = vector.multi_reduction <add>, %3, %cst [1] : vector<8x32xf32> to vector<8xf32>
    %5 = vector.shape_cast %4 : vector<8xf32> to vector<8x1xf32>
    %cst_5 = arith.constant 1.000000e-24 : f32
    %6 = vector.broadcast %cst_5 : f32 to vector<8x1xf32>
    %7 = arith.maximumf %5, %6 : vector<8x1xf32>
    %8 = math.rsqrt %7 : vector<8x1xf32>
    %9 = vector.broadcast %8 : vector<8x1xf32> to vector<8x32xf32>
    %10 = arith.mulf %0, %9 : vector<8x32xf32>
    %cst_6 = arith.constant dense<0.000000e+00> : vector<20x8xf32>
    %11 = tpu.matmul %1, %10, %cst_6 {dimension_numbers = #tpu.dot_dimension_numbers<[1], [1], [0], [0], [0, 0, 1, 0], [], []>} : vector<20x32xf32>, vector<8x32xf32>, vector<20x8xf32> -> vector<20x8xf32>
    %cst_7 = arith.constant dense<0xFF800000> : vector<8xf32>
    %12 = vector.multi_reduction <maximumf>, %11, %cst_7 [0] : vector<20x8xf32> to vector<8xf32>
    %13 = vector.shape_cast %12 : vector<8xf32> to vector<1x8xf32>
    %c0_i32 = arith.constant 0 : i32
    %14 = vector.broadcast %c0_i32 : i32 to vector<1x8xi32>
    %15 = arith.cmpi eq, %2, %14 : vector<1x8xi32>
    %c1_i32 = arith.constant 1 : i32
    %16 = vector.broadcast %c1_i32 : i32 to vector<1x8xi32>
    %17 = arith.cmpi eq, %2, %16 : vector<1x8xi32>
    %cst_8 = arith.constant 5.000000e-01 : f32
    %18 = vector.broadcast %cst_8 : f32 to vector<1x8xf32>
    %19 = arith.subf %18, %13 : vector<1x8xf32>
    %20 = arith.select %15, %19, %13 : vector<1x8xi1>, vector<1x8xf32>
    %cst_9 = arith.constant 2.000000e-01 : f32
    %21 = vector.broadcast %cst_9 : f32 to vector<1x8xf32>
    %22 = arith.subf %20, %21 : vector<1x8xf32>
    %23 = arith.select %17, %22, %20 : vector<1x8xi1>, vector<1x8xf32>
    %cst_10 = arith.constant 2.000000e+01 : f32
    %24 = vector.broadcast %cst_10 : f32 to vector<1x8xf32>
    %25 = arith.mulf %24, %23 : vector<1x8xf32>
    %cst_11 = arith.constant 0.000000e+00 : f32
    %26 = vector.broadcast %cst_11 : f32 to vector<1x8xf32>
    %27 = arith.maximumf %25, %26 : vector<1x8xf32>
    %28 = math.absf %25 : vector<1x8xf32>
    %cst_12 = arith.constant 0.000000e+00 : f32
    %29 = vector.broadcast %cst_12 : f32 to vector<1x8xf32>
    %30 = arith.subf %29, %28 : vector<1x8xf32>
    %31 = math.exp %30 : vector<1x8xf32>
    %32 = math.log1p %31 : vector<1x8xf32>
    %33 = arith.addf %27, %32 : vector<1x8xf32>
    %c0_13 = arith.constant 0 : index
    %c0_14 = arith.constant 0 : index
    %34 = vector.load %arg4[%c0_13, %c0_14] : memref<1x8xf32, #tpu.memory_space<vmem>>, vector<1x8xf32>
    tpu.vector_store %arg4[%c0_13, %c0_14], %33 {strides = array<i32>} : memref<1x8xf32, #tpu.memory_space<vmem>>, vector<1x8xf32>,
    %c0_15 = arith.constant 0 : index
    %c0_16 = arith.constant 0 : index
    %35 = vector.load %arg5[%c0_15, %c0_16] : memref<1x8xf32, #tpu.memory_space<vmem>>, vector<1x8xf32>
    tpu.vector_store %arg5[%c0_15, %c0_16], %13 {strides = array<i32>} : memref<1x8xf32, #tpu.memory_space<vmem>>, vector<1x8xf32>,
    return
  }
  func.func @transform_0(%arg0: i32) -> (i32, i32) {
    %c0_i32 = arith.constant 0 : i32
    %c0_i32_0 = arith.constant 0 : i32
    return %arg0, %c0_i32 : i32, i32
  }
  func.func @transform_1(%arg0: i32) -> (i32, i32) {
    %c0_i32 = arith.constant 0 : i32
    %c0_i32_0 = arith.constant 0 : i32
    %c0_i32_1 = arith.constant 0 : i32
    return %c0_i32, %c0_i32_0 : i32, i32
  }
  func.func @transform_2(%arg0: i32) -> (i32, i32) {
    %c0_i32 = arith.constant 0 : i32
    %c0_i32_0 = arith.constant 0 : i32
    return %c0_i32, %arg0 : i32, i32
  }
  func.func @transform_3(%arg0: i32) -> (i32, i32) {
    %c0_i32 = arith.constant 0 : i32
    %c0_i32_0 = arith.constant 0 : i32
    return %c0_i32, %arg0 : i32, i32
  }
  func.func @transform_4(%arg0: i32) -> (i32, i32) {
    %c0_i32 = arith.constant 0 : i32
    %c0_i32_0 = arith.constant 0 : i32
    return %c0_i32, %arg0 : i32, i32
  }
}

</mosaic_0001>

<bundles_post_ra>
// kernel: tpu_custom_call.1
= control target key start
LH: loop header
LB: loop body
LE: loop exit
PB: predicated region body
PF: predicated region fallthrough
CT: control target
= control target key end

     0   :  { %10 = vsyncpa [#allocation3], 0  ;;  %s358_s0 = inlined_call_operand.hbm [shape: f32[8,32], index: 0, kind: input, shape index: {}]   ;;  %s359_s1 = inlined_call_operand.hbm [shape: f32[20,32], index: 1, kind: input, shape index: {}]   ;;  %s360_s2 = inlined_call_operand.vmem [shape: s32[1,8], index: 2, kind: input, shape index: {}]   ;;  %s361_s3 = inlined_call_operand.hbm [shape: f32[1,8], index: 3, kind: output, shape index: {0}]   ;;  %s362_s4 = inlined_call_operand.hbm [shape: f32[1,8], index: 4, kind: output, shape index: {1}]  }
   0x1   :  { %11 = vsyncpa [#allocation6], 0 }
   0x2   :  { %12 = vsyncpa [#allocation4], 0 }
   0x3   :  { %13 = vsyncpa [#allocation9], 0  ;;  %s19_s17 = sshll.u32 %s358_s0, 4  ;;  %s303_s18 = smov [#allocation2]   ;;  %s20_s17 = int_to_ptr.hbm [resolvable:$true] %s19_s17 }
   0x4   :  { %s21_s19 = sshll.u32 %s303_s18, 4  ;;  %s29_s22 = sshll.u32 %s359_s1, 4  ;;  %s22_s19 = int_to_ptr.vmem [resolvable:$true] %s21_s19  ;;  %s30_s22 = int_to_ptr.hbm [resolvable:$true] %s29_s22 }
   0x5   :  { %24 = dma.hbm_to_vmem [thread:$0]  %s20_s17, 128, %s22_s19, [#allocation3]  }
   0x6   :  { %s304_s23 = smov [#allocation5]   ;;  %s305_s25 = smov 128  }
   0x7   :  { %s31_s24 = sshll.u32 %s304_s23, 4  ;;  %s306_s26 = smov 8   ;;  %s32_s24 = int_to_ptr.vmem [resolvable:$true] %s31_s24 }
   0x8   :  { %37 = dma.hbm_to_vmem [thread:$0]  %s30_s22, 384, %s32_s24, [#allocation6], %s305_s25, %s305_s25, %s306_s26  }
   0x9   :  { %295 = dma.done.wait [#allocation3], 128  }
   0xa   :  { %296 = vsyncadd [#allocation3], 4294967168 }
   0xb   :  { %297 = dma.done.wait [#allocation6], 384  }
   0xc   :  { %298 = vsyncadd [#allocation6], 4294966912  ;;  %v48_v0 = vld [vmem:[#allocation2] sm:$0xff]  ;;  %vm54_vm0 = vcmask 261120   ;;  %v49_v13 = vld [vmem:[#allocation5] sm:$0xff]  ;;  %vm108_vm4 = vcmask 64512  }
   0xd   :  { %v53_v1 = vmul.f32 %v48_v0, %v48_v0  ;;  %v50_v14 = vld [vmem:[#allocation5 + $0x8] sm:$0xff]  ;;  %v51_v15 = vld [vmem:[#allocation5 + $0x10] sm:$0xf]  ;;  %vm111_vm5 = vcmask 60416   ;;  %s307_s0 = smov [#allocation8]   ;;  %s164_s29 = sshll.u32 %s362_s4, 4  ;;  %s165_s29 = int_to_ptr.hbm [resolvable:$true] %s164_s29 }
   0xe   :  { %s162_s1 = sshll.u32 %s307_s0, 4  ;;  %v52_v28 = vld [vmem:[%s360_s2] sm:$0x1]  ;;  %vm143_vm6 = vcmask 57344   ;;  %s308_s2 = smov [#allocation7]   ;;  %s163_s1 = int_to_ptr.vmem [resolvable:$true] %s162_s1 }
   0xf   :  { %v55_v2 = vsel %vm54_vm0, %v53_v1, 0.0  ;;  %vm121_vm7 = vcmp.eq.s32.totalorder %v52_v28, 0  ;;  %vm122_vm8 = vcmp.eq.s32.totalorder %v52_v28, 1  ;;  %s151_s4 = sshll.u32 %s308_s2, 4  ;;  %s153_s8 = sshll.u32 %s361_s3, 4  ;;  %s152_s4 = int_to_ptr.vmem [resolvable:$true] %s151_s4  ;;  %s154_s8 = int_to_ptr.hbm [resolvable:$true] %s153_s8 }
  0x10   :  { %56 = vadd.xlane.f32.xlu0 %v55_v2 }
  0x83   :  { %v57_v3 = vpop.xlane.xlu0 %56 }
  0x84   :  { %v58_v4 = vmax.f32 %v57_v3, 1e-24 }
  0x86   :  { %193 = vrsqrt.f32 %v58_v4  ;;  %vm65_vm2 = vweird.f32 %v58_v4 }
  0x8c   :  { %v194_v5 = vpop.eup %193 }
  0x8d   :  { %v60_v6 = vmul.f32 %v194_v5, %v58_v4  ;;  %vm66_vm1 = vweird.f32 %v194_v5 }
  0x8e   :  { %vm67_vm3 = vmor %vm65_vm2, %vm66_vm1 }
  0x8f   :  { %v61_v7 = vmul.f32 %v194_v5, %v60_v6 }
  0x91   :  { %v62_v8 = vmul.f32 0.5, %v61_v7 }
  0x93   :  { %v63_v9 = vsub.f32 1.5, %v62_v8 }
  0x95   :  { %v64_v10 = vmul.f32 %v194_v5, %v63_v9 }
  0x97   :  { %v68_v11 = vsel %vm67_vm3, %v194_v5, %v64_v10 }
  0x98   :  { %v69_v12 = vmul.f32 %v68_v11, %v48_v0 }
  0x9a   :  { %180 = vmatpush.xpose.msk.msra.mxu0 %vm54_vm0, %v69_v12  ;;  %185 = vmatpush.xpose.msk.msra.mxu1 %vm54_vm0, %v69_v12 }
  0x9b   :  { %186 = vmatpush.xpose.msk.msra.mxu2 %vm54_vm0, %v69_v12 }
  0x9d   :  { %181 = vmatmul.msk.f32.vlgmr.msra.gmra.mxu0 %vm54_vm0, %v49_v13  ;;  %182 = vmatmul.msk.f32.vlgmr.msra.gmra.mxu1 %vm54_vm0, %v50_v14 }
  0x9e   :  { %183 = vmatmul.msk.f32.vlgmr.msra.gmra.mxu2 %vm54_vm0, %v51_v15 }
 0x11a   :  { %v99_v16 = vpop.f32.mrf.mxu0  ;;  %v102_v17 = vpop.f32.mrf.mxu1 }
 0x11b   :  { %v109_v18 = vsel %vm108_vm4, %v99_v16, -inf  ;;  %v110_v19 = vsel %vm108_vm4, %v102_v17, -inf }
 0x11c   :  { %v113_v20 = vmax.f32 %v109_v18, %v110_v19 }
 0x121   :  { %v105_v21 = vpop.f32.mrf.mxu2 }
 0x122   :  { %v112_v22 = vsel %vm111_vm5, %v105_v21, -inf }
 0x123   :  { %v114_v23 = vmax.f32 %v113_v20, %v112_v22 }
 0x125   :  { %v115_v24 = vrot.slane %v114_v23, 4 }
 0x127   :  { %v116_v25 = vmax.f32 %v114_v23, %v115_v24 }
 0x129   :  { %v117_v26 = vrot.slane %v116_v25, 2 }
 0x12b   :  { %v118_v27 = vmax.f32 %v116_v25, %v117_v26 }
 0x12d   :  { %v119_v29 = vrot.slane %v118_v27, 1 }
 0x12f   :  { %v120_v30 = vmax.f32 %v118_v27, %v119_v29 }
 0x131   :  { %v123_v31 = vsub.f32 0.5, %v120_v30  ;;  %145 = vst.msk [vmem:[#allocation8] sm:$0x1] %vm143_vm6, %v120_v30 }
 0x132   :  { %167 = dma.vmem_to_hbm [thread:$0]  %s163_s1, 16, %s165_s29, [#allocation9]  }
 0x133   :  { %v124_v32 = vsel %vm121_vm7, %v123_v31, %v120_v30 }
 0x134   :  { %v184_v33 = vadd.f32 -0.2, %v124_v32 }
 0x136   :  { %v126_v34 = vsel %vm122_vm8, %v184_v33, %v124_v32 }
 0x137   :  { %v127_v35 = vmul.f32 20.0, %v126_v34 }
 0x139   :  { %v129_v36 = vand.u32 2147483647, %v127_v35  ;;  %v128_v47 = vmax.f32 %v127_v35, 0.0 }
 0x13b   :  { %v130_v37 = vsub.f32 0.0, %v129_v36 }
 0x13d   :  { %v131_v38 = vmul.f32 1.442695, %v130_v37 }
 0x13f   :  { %195 = vpow2.f32 %v131_v38 }
 0x145   :  { %v196_v39 = vpop.eup %195 }
 0x146   :  { %v133_v40 = vadd.f32 1.0, %v196_v39  ;;  %v136_v41 = vmul.f32 -0.5, %v196_v39  ;;  %v139_v43 = vand.u32 2147483647, %v196_v39 }
 0x148   :  { %197 = vlog2.f32 %v133_v40  ;;  %v137_v42 = vadd.f32 1.0, %v136_v41  ;;  %vm140_vm9 = vcmp.lt.f32.partialorder %v139_v43, 0.0004427343 }
 0x14a   :  { %v138_v46 = vmul.f32 %v196_v39, %v137_v42 }
 0x14e   :  { %v198_v44 = vpop.eup %197 }
 0x14f   :  { %v135_v45 = vmul.f32 0.6931472, %v198_v44 }
 0x151   :  { %v141_v48 = vsel %vm140_vm9, %v138_v46, %v135_v45 }
 0x152   :  { %v142_v49 = vadd.f32 %v141_v48, %v128_v47 }
 0x154   :  { %144 = vst.msk [vmem:[#allocation7] sm:$0x1] %vm143_vm6, %v142_v49 }
 0x155   :  { %156 = dma.vmem_to_hbm [thread:$0]  %s152_s4, 16, %s154_s8, [#allocation4]  }
 0x156   :  { %299 = dma.done.wait [#allocation4], 16  }
 0x157   :  { %300 = vsyncadd [#allocation4], 4294967280 }
 0x158   :  { %301 = dma.done.wait [#allocation9], 16  }
 0x159   :  { %302 = vsyncadd [#allocation9], 4294967280 }
 0x15a   :  { %176 = vsyncpa [#allocation3], 1 }
 0x15b   :  { %177 = vsyncpa [#allocation6], 1 }
 0x15c   :  { %178 = vsyncpa [#allocation4], 1 }
 0x15d   :  { %179 = vsyncpa [#allocation9], 1 }

</bundles_post_ra>
